<compile_context>
chip_gen: v5e
topology: v5e:2x2
jax: 0.10.0
libtpu: 0.0.40
codegen_flags: <defaults>
</compile_context>

<pallas_src>
import functools

import jax
import jax.numpy as jnp
from jax.experimental import pallas as pl
from jax.experimental.pallas import tpu as pltpu


def _folded_conv_kernel(x_ref, w_ref, bias_ref, o_ref, *, n_taps, wout):
    """out = W_big @ im2col(x) + bias.

    x_ref    : (Ci, Win)           all batches along lanes (zero halos baked in)
    w_ref    : (S*Co, n_taps*Ci)   folded polyphase weights
    bias_ref : (S*Co, Wout)        per-column bias (f32, precomputed)
    o_ref    : (S*Co, Wout)        phase-separated output
    """
    x = x_ref[...]
    # n_taps shifted views stacked along sublanes -> ONE MXU contraction of
    # depth n_taps*Ci.  Static slices only: no pads, no interleave, no stack.
    cols = jnp.concatenate([x[:, o:o + wout] for o in range(n_taps)], axis=0)
    acc = jnp.dot(w_ref[...], cols, preferred_element_type=jnp.float32)
    o_ref[...] = (acc + bias_ref[...]).astype(o_ref.dtype)


def double_conv_up_1d(x, wt, bt, w, b, *, stride=1, output_padding=0, padding=0):
    """x: (N, Ci, L) -> (N, Co, L_out), matching DoubleConvUp1d.forward.

    wt: (Ci, Ci, S) ConvTranspose1d weight, bt: (Ci,) / (Ci, 1) its bias
        (pass None for both when stride == 1, i.e. the nn.Identity branch).
    w:  (Co, Ci, K) Conv1d weight, b: (Co,) / (Co, 1) its bias.
    """
    N, Ci, L = x.shape
    Co, _, K = w.shape
    S = int(stride)
    P = int(padding)
    op = int(output_padding) if S > 1 else 0

    if S == 1:
        # nn.Identity upsample: synthesize an identity "transpose conv".
        wt = jnp.eye(Ci, dtype=x.dtype)[:, :, None]
        bt = jnp.zeros((Ci,), x.dtype)
    bt = jnp.asarray(bt).reshape(Ci).astype(jnp.float32)
    b = jnp.asarray(b).reshape(Co).astype(jnp.float32)

    L_up = L * S + op
    L_out = L_up + 2 * P - K + 1
    assert L_out > 0
    M = -(-L_out // S)                       # output columns per phase (ceil)

    # ---- fold ConvTranspose1d weights into the Conv1d weights (wrapper/XLA) --
    # Composite linear map: y[o, t] = sum_{c,l} A[o, c, t - l*S] * x[c, l]
    #   A[o, c, d] = sum_{ci,k} w[o, ci, k] * wt[c, ci, d + k - P], wt idx in [0,S)
    dmin, dmax = P - K + 1, P + S - 1
    wf, wtf = w.astype(jnp.float32), wt.astype(jnp.float32)
    A = {}
    for d in range(dmin, dmax + 1):
        acc = jnp.zeros((Co, Ci), jnp.float32)
        for k in range(K):
            s = d + k - P
            if 0 <= s < S:
                acc = acc + wf[:, :, k] @ wtf[:, :, s].T
        A[d] = acc

    # Polyphase taps: output phase p, column m uses x[:, m - j], weight A[p + j*S].
    j_max = dmax // S
    j_min = -((S - 1 - dmin) // S)
    J = j_max - j_min + 1
    zero = jnp.zeros((Co, Ci), jnp.float32)
    w_rows = []
    for p in range(S):
        taps = [A.get(p + (j_max - o) * S, zero) for o in range(J)]
        w_rows.append(jnp.concatenate(taps, axis=1))          # (Co, J*Ci)
    W_big = jnp.concatenate(w_rows, axis=0).astype(x.dtype)   # (S*Co, J*Ci)

    # ---- per-output-position bias (exact at boundaries / output_padding) -----
    wb = jnp.einsum('ock,c->ok', wf, bt)                      # (Co, K)
    t = jnp.arange(M * S)
    u = t[None, :] + jnp.arange(K)[:, None] - P               # (K, M*S)
    mask = ((u >= 0) & (u < L_up)).astype(jnp.float32)
    bias_map = b[:, None] + wb @ mask                         # (Co, M*S)
    bias_phase = bias_map.reshape(Co, M, S).transpose(2, 0, 1).reshape(S * Co, M)

    # ---- lay all batches along the lane dimension with zero-halo gaps --------
    B = max(L + j_max, M - j_min)            # per-batch segment width (lanes)
    Wout = N * B
    Win = Wout + J - 1
    x_arr = jnp.zeros((Ci, N, B), x.dtype)
    x_arr = x_arr.at[:, :, j_max:j_max + L].set(x.transpose(1, 0, 2))
    x_arr = jnp.pad(x_arr.reshape(Ci, Wout), ((0, 0), (0, J - 1)))  # (Ci, Win)

    bias_arr = jnp.zeros((S * Co, N, B), jnp.float32)
    bias_arr = bias_arr.at[:, :, :M].set(
        jnp.broadcast_to(bias_phase[:, None, :], (S * Co, N, M)))
    bias_arr = bias_arr.reshape(S * Co, Wout)

    kernel = functools.partial(_folded_conv_kernel, n_taps=J, wout=Wout)
    out_arr = pl.pallas_call(
        kernel,
        out_shape=jax.ShapeDtypeStruct((S * Co, Wout), x.dtype),
        grid=(1,),
        in_specs=[
            pl.BlockSpec((Ci, Win), lambda i: (0, 0)),
            pl.BlockSpec((S * Co, J * Ci), lambda i: (0, 0)),
            pl.BlockSpec((S * Co, Wout), lambda i: (0, 0)),
        ],
        out_specs=pl.BlockSpec((S * Co, Wout), lambda i: (0, 0)),
        compiler_params=pltpu.CompilerParams(
            dimension_semantics=("arbitrary",)),
    )(x_arr, W_big, bias_arr)

    # ---- phase re-interleave + un-batch: one cheap XLA layout fixup ----------
    out = out_arr.reshape(S, Co, N, B)[:, :, :, :M]           # (S, Co, N, M)
    out = out.transpose(2, 1, 3, 0).reshape(N, Co, M * S)[:, :, :L_out]
    return out


if __name__ == "__main__":
    # DoubleConvUp1d(in_dim=4, out_dim=8, kernel_size=3, stride=2, padding=1,
    #                output_padding=0)
    N, Ci, L = 2, 4, 16
    Co, K, stride, padding, output_padding = 8, 3, 2, 1, 0

    key = jax.random.PRNGKey(0)
    k1, k2, k3, k4, k5 = jax.random.split(key, 5)
    x = jax.random.normal(k1, (N, Ci, L), jnp.float32)
    # ConvTranspose1d(in, in, kernel_size=stride): weight (Ci, Ci, S), bias (Ci,)
    wt = 0.1 * jax.random.normal(k2, (Ci, Ci, stride), jnp.float32)
    bt = 0.1 * jax.random.normal(k3, (Ci, 1), jnp.float32)
    # Conv1d(in, out, kernel_size=K): weight (Co, Ci, K), bias (Co,)
    w = 0.1 * jax.random.normal(k4, (Co, Ci, K), jnp.float32)
    b = 0.1 * jax.random.normal(k5, (Co, 1), jnp.float32)

    fwd = jax.jit(functools.partial(double_conv_up_1d, stride=stride,
                                    output_padding=output_padding,
                                    padding=padding))
    out = jax.block_until_ready(fwd(x, wt, bt, w, b))

    # Plain-JAX reference (torch ConvTranspose1d + Conv1d semantics; bias is
    # applied over the full upsampled length, including output_padding).
    S = stride
    up0 = jnp.einsum('ncl,cos->nols', x, wt).reshape(N, Ci, L * S)
    if output_padding > 0:
        up0 = jnp.pad(up0, ((0, 0), (0, 0), (0, output_padding)))
    up = up0 + bt[None]
    up_pad = jnp.pad(up, ((0, 0), (0, 0), (padding, padding)))
    L_out = up.shape[-1] + 2 * padding - K + 1
    ref = sum(jnp.einsum('nct,oc->not', up_pad[:, :, k:k + L_out], w[:, :, k])
              for k in range(K)) + b[None]

    assert out.shape == (N, Co, L_out), out.shape
    err = float(jnp.max(jnp.abs(out - ref)))
    assert jnp.allclose(out, ref, atol=1e-5, rtol=1e-5), err
    print("KERNEL_OK")
</pallas_src>

<mosaic_0001>
module attributes {stable_mosaic.version = 11 : i64} {
  func.func @_folded_conv_kernel(%arg0: i32, %arg1: memref<4x36xf32, #tpu.memory_space<vmem>>, %arg2: memref<16x12xf32, #tpu.memory_space<vmem>>, %arg3: memref<16x34xf32, #tpu.memory_space<vmem>>, %arg4: memref<16x34xf32, #tpu.memory_space<vmem>>) attributes {dimension_semantics = [#tpu.dimension_semantics<arbitrary>], iteration_bounds = array<i64: 1>, scalar_prefetch = 0 : i64, scratch_operands = 0 : i64, tpu.core_type = #tpu.core_type<tc>, window_params = [{pipeline_mode = #tpu.pipeline_mode<synchronous>, transform_indices = @transform_0, window_bounds = array<i64: 4, 36>}, {pipeline_mode = #tpu.pipeline_mode<synchronous>, transform_indices = @transform_1, window_bounds = array<i64: 16, 12>}, {pipeline_mode = #tpu.pipeline_mode<synchronous>, transform_indices = @transform_2, window_bounds = array<i64: 16, 34>}, {pipeline_mode = #tpu.pipeline_mode<synchronous>, transform_indices = @transform_3, window_bounds = array<i64: 16, 34>}]} {
    %c0 = arith.constant 0 : index
    %c0_0 = arith.constant 0 : index
    %0 = vector.load %arg1[%c0, %c0_0] : memref<4x36xf32, #tpu.memory_space<vmem>>, vector<4x36xf32>
    %1 = vector.extract_strided_slice %0 {offsets = [0, 0], sizes = [4, 34], strides = [1, 1]} : vector<4x36xf32> to vector<4x34xf32>
    %2 = vector.extract_strided_slice %0 {offsets = [0, 1], sizes = [4, 34], strides = [1, 1]} : vector<4x36xf32> to vector<4x34xf32>
    %3 = vector.extract_strided_slice %0 {offsets = [0, 2], sizes = [4, 34], strides = [1, 1]} : vector<4x36xf32> to vector<4x34xf32>
    %4 = tpu.concatenate %1, %2, %3 in 0 : vector<4x34xf32>, vector<4x34xf32>, vector<4x34xf32> -> vector<12x34xf32>
    %c0_1 = arith.constant 0 : index
    %c0_2 = arith.constant 0 : index
    %5 = vector.load %arg2[%c0_1, %c0_2] : memref<16x12xf32, #tpu.memory_space<vmem>>, vector<16x12xf32>
    %cst = arith.constant dense<0.000000e+00> : vector<16x34xf32>
    %6 = tpu.matmul %5, %4, %cst {dimension_numbers = #tpu.dot_dimension_numbers<[1], [0], [0], [1], [0, 0, 1, 1], [], []>} : vector<16x12xf32>, vector<12x34xf32>, vector<16x34xf32> -> vector<16x34xf32>
    %c0_3 = arith.constant 0 : index
    %c0_4 = arith.constant 0 : index
    %7 = vector.load %arg3[%c0_3, %c0_4] : memref<16x34xf32, #tpu.memory_space<vmem>>, vector<16x34xf32>
    %8 = arith.addf %6, %7 : vector<16x34xf32>
    %c0_5 = arith.constant 0 : index
    %c0_6 = arith.constant 0 : index
    %9 = vector.load %arg4[%c0_5, %c0_6] : memref<16x34xf32, #tpu.memory_space<vmem>>, vector<16x34xf32>
    tpu.vector_store %arg4[%c0_5, %c0_6], %8 {strides = array<i32>} : memref<16x34xf32, #tpu.memory_space<vmem>>, vector<16x34xf32>,
    return
  }
  func.func @transform_0(%arg0: i32) -> (i32, i32) {
    %c0_i32 = arith.constant 0 : i32
    %c0_i32_0 = arith.constant 0 : i32
    %c0_i32_1 = arith.constant 0 : i32
    return %c0_i32, %c0_i32_0 : i32, i32
  }
  func.func @transform_1(%arg0: i32) -> (i32, i32) {
    %c0_i32 = arith.constant 0 : i32
    %c0_i32_0 = arith.constant 0 : i32
    %c0_i32_1 = arith.constant 0 : i32
    return %c0_i32, %c0_i32_0 : i32, i32
  }
  func.func @transform_2(%arg0: i32) -> (i32, i32) {
    %c0_i32 = arith.constant 0 : i32
    %c0_i32_0 = arith.constant 0 : i32
    %c0_i32_1 = arith.constant 0 : i32
    return %c0_i32, %c0_i32_0 : i32, i32
  }
  func.func @transform_3(%arg0: i32) -> (i32, i32) {
    %c0_i32 = arith.constant 0 : i32
    %c0_i32_0 = arith.constant 0 : i32
    %c0_i32_1 = arith.constant 0 : i32
    return %c0_i32, %c0_i32_0 : i32, i32
  }
}

</mosaic_0001>

<bundles_post_ra>
// kernel: double_conv_up_1d.1
= control target key start
LH: loop header
LB: loop body
LE: loop exit
PB: predicated region body
PF: predicated region fallthrough
CT: control target
= control target key end

     0   :  { %s74_s14 = smov 126   ;;  %s75_s15 = smov 127   ;;  %vm22_vm0 = vcmask 1043456   ;;  %vm28_vm1 = vcmask 97280   ;;  %vm60_vm2 = vcmask 277504   ;;  %s117_s0 = inlined_call_operand.vmem [shape: f32[4,36], index: 0, kind: input, shape index: {}]   ;;  %s118_s1 = inlined_call_operand.vmem [shape: f32[16,12], index: 1, kind: input, shape index: {}]   ;;  %s119_s2 = inlined_call_operand.vmem [shape: f32[16,34], index: 2, kind: input, shape index: {}]   ;;  %s120_s3 = inlined_call_operand.vmem [shape: f32[16,34], index: 3, kind: output, shape index: {}]  }
   0x1   :  { %v14_v0 = vld [vmem:[%s117_s0] sm:$0xf]  ;;  %v25_v5 = vld [vmem:[%s118_s1 + $0x8] sm:$0xff] }
   0x2   :  { %20 = vrot.lane.b32.xlu0 %v14_v0, %s74_s14  ;;  %v16_v1 = vrot.slane %v14_v0, 4  ;;  %v24_v4 = vld [vmem:[%s118_s1] sm:$0xff]  ;;  %v27_v8 = vld [vmem:[%s119_s2 + $0x8] sm:$0xff] }
   0x3   :  { %v26_v7 = vld [vmem:[%s119_s2] sm:$0xff] }
   0xa   :  { %17 = vrot.lane.b32.xlu0 %v16_v1, %s75_s15 }
  0x74   :  { %v21_v2 = vpop.permute.xlu0 %20 }
  0x75   :  { %67 = vmatpush.msk.msra.mxu0 %vm22_vm0, %v21_v2  ;;  %70 = vmatpush.msk.msra.mxu1 %vm22_vm0, %v21_v2 }
  0x7c   :  { %v18_v3 = vpop.permute.xlu0 %17 }
  0x7d   :  { %v23_v6 = vsel %vm22_vm0, %v14_v0, %v18_v3 }
  0x7e   :  { %52 = vmatpush.msra.mxu0 %v23_v6  ;;  %71 = vmatpush.msra.mxu1 %v23_v6 }
  0x7f   :  { %68 = vmatmul.msk.f32.vlgmr.msra.gmra.mxu0 %vm28_vm1, %v24_v4  ;;  %69 = vmatmul.msk.f32.vlgmr.msra.gmra.mxu1 %vm28_vm1, %v25_v5 }
  0xfc   :  { %v54_v9 = vpop.f32.mrf.mxu0  ;;  %v57_v10 = vpop.f32.mrf.mxu1 }
  0xfd   :  { %v55_v11 = vadd.f32 %v54_v9, %v26_v7  ;;  %v58_v12 = vadd.f32 %v57_v10, %v27_v8 }
  0xff   :  { %61 = vst.msk [vmem:[%s120_s3] sm:$0xff] %vm60_vm2, %v55_v11 }
 0x100   :  { %62 = vst.msk [vmem:[%s120_s3 + $0x8] sm:$0xff] %vm60_vm2, %v58_v12 }

</bundles_post_ra>
